<compile_context>
chip_gen: v6e
topology: v6e:2x2x1
jax: 0.10.0
libtpu: 0.0.40
codegen_flags: <defaults>
</compile_context>

<pallas_src>
import functools

import jax
import jax.numpy as jnp
from jax.experimental import pallas as pl
from jax.experimental.pallas import tpu as pltpu


# ----------------------------------------------------------------------------
# Helpers
# ----------------------------------------------------------------------------
def _round_up(n: int, m: int) -> int:
    return ((n + m - 1) // m) * m


def _tensorcores_per_device() -> int:
    """2 for multi-TensorCore chips (v7x / megacore), else 1."""
    try:
        kind = jax.devices()[0].device_kind.lower().replace(" ", "")
    except Exception:
        return 1
    if "v7" in kind:
        return 2
    if "v4" in kind or "v5p" in kind:
        return 2
    return 1


def _choose_batch_tile(batch: int, num_cores: int, row_bytes: int,
                       fixed_bytes: int, vmem_budget: int) -> int:
    """Largest batch tile that fits the VMEM budget.

    On multi-TC chips prefer an even number of >= num_cores grid steps so the
    parallel grid axis shards across cores; on 1-TC chips prefer one big step
    (no per-step overhead, no extra output writeback).
    """
    candidates = [t for t in (1024, 512, 256, 128, 64, 32, 16, 8)
                  if t <= batch and batch % t == 0]
    if not candidates:
        candidates = [batch]

    def fits(t):
        return fixed_bytes + t * row_bytes <= vmem_budget

    if num_cores >= 2:
        for t in candidates:
            steps = batch // t
            if steps >= num_cores and steps % num_cores == 0 and fits(t):
                return t
    for t in candidates:
        if fits(t):
            return t
    # TODO(synk): resident weights alone exceed the VMEM budget -> stream
    # per-layer weight blocks (stacked (L, K, N) array + emit_pipeline) instead
    # of keeping every layer resident.
    return candidates[-1]


def _apply_activation(h, activation: str):
    # h is f32 here (accumulator dtype) -> safe on v5e's f32-only VPU/EUP.
    if activation == "relu":
        return jnp.maximum(h, 0.0)
    elif activation == "leakyrelu":
        # nn.LeakyReLU default negative_slope = 0.01
        return jnp.where(h >= 0.0, h, 0.01 * h)
    elif activation == "tanh":
        return jnp.tanh(h)  # routes to the EUP (separate slot)
    else:
        raise ValueError(f"Unknown activation function '{activation}'")


# ----------------------------------------------------------------------------
# Kernel
# ----------------------------------------------------------------------------
def _latent_mlp_kernel(x_ref, *refs, num_layers: int, activation: str):
    """Fused MLP over one batch tile.

    refs = (w1, b1, w2, b2, ..., wN, bN, out_ref).
    Weights are in the compute dtype (N padded to 128-lane multiples),
    biases are pre-cast f32.
    """
    out_ref = refs[-1]
    params = refs[:-1]

    h = x_ref[...]  # compute dtype (f32 or bf16); MXU gets it natively
    for layer in range(num_layers):
        w = params[2 * layer][...]
        b = params[2 * layer + 1][...]  # (1, n_pad), f32
        acc = jnp.dot(h, w, preferred_element_type=jnp.float32) + b
        acc = _apply_activation(acc, activation)
        # Cast back to the compute dtype only between layers (keeps bf16 MXU
        # operands bf16); final layer stays in f32 until the store.
        h = acc.astype(w.dtype) if layer + 1 < num_layers else acc
    out_ref[...] = h.astype(out_ref.dtype)


# ----------------------------------------------------------------------------
# Jitted forward implementation (params already prepared / padded)
# ----------------------------------------------------------------------------
def _latent_mlp_forward_impl(x, padded_weights, padded_biases, *,
                             activation: str, latent_dimension: int,
                             k0_pad: int, trim_output: bool):
    batch, in_features = x.shape
    num_layers = len(padded_weights)
    compute_dtype = padded_weights[0].dtype
    n_out_pad = padded_weights[-1].shape[1]
    out_dtype = x.dtype

    x_p = x.astype(compute_dtype)
    if k0_pad != in_features:
        x_p = jnp.pad(x_p, ((0, 0), (0, k0_pad - in_features)))

    # ---- VMEM accounting (resident params are double-buffered by default) --
    itemsize = jnp.dtype(compute_dtype).itemsize
    out_itemsize = jnp.dtype(out_dtype).itemsize
    fixed_bytes = (sum(2 * w.size * w.dtype.itemsize for w in padded_weights)
                   + sum(2 * b.size * b.dtype.itemsize for b in padded_biases))
    max_n_pad = max(w.shape[1] for w in padded_weights)
    # x tile + out tile double-buffered, plus f32 intermediate slack per row.
    row_bytes = 2 * k0_pad * itemsize + 2 * n_out_pad * out_itemsize + 3 * max_n_pad * 4

    vmem_budget = 48 * 1024 * 1024  # safe on v7x's 64 MiB physical VMEM
    num_cores = _tensorcores_per_device()
    batch_tile = _choose_batch_tile(batch, num_cores, row_bytes, fixed_bytes,
                                    vmem_budget)
    grid = (batch // batch_tile,)

    needed_bytes = fixed_bytes + batch_tile * row_bytes
    vmem_limit = int(min(max(2 * needed_bytes, 16 * 1024 * 1024),
                         48 * 1024 * 1024))

    # ---- Specs --------------------------------------------------------------
    in_specs = [pl.BlockSpec((batch_tile, k0_pad), lambda i: (i, 0))]
    args = [x_p]
    for w_p, b_p in zip(padded_weights, padded_biases):
        in_specs.append(pl.BlockSpec(w_p.shape, lambda i: (0, 0)))  # resident
        in_specs.append(pl.BlockSpec(b_p.shape, lambda i: (0, 0)))  # resident
        args.extend([w_p, b_p])
    out_spec = pl.BlockSpec((batch_tile, n_out_pad), lambda i: (i, 0))

    # ---- Cost estimate ------------------------------------------------------
    flops = 2 * batch * sum(w.shape[0] * w.shape[1] for w in padded_weights)
    transcendentals = (batch * sum(w.shape[1] for w in padded_weights)
                       if activation == "tanh" else 0)
    bytes_accessed = (batch * k0_pad * itemsize
                      + sum(w.size * w.dtype.itemsize for w in padded_weights)
                      + sum(b.size * b.dtype.itemsize for b in padded_biases)
                      + batch * n_out_pad * out_itemsize)

    kernel = functools.partial(_latent_mlp_kernel, num_layers=num_layers,
                               activation=activation)

    out_padded = pl.pallas_call(
        kernel,
        out_shape=jax.ShapeDtypeStruct((batch, n_out_pad), out_dtype),
        grid=grid,
        in_specs=in_specs,
        out_specs=out_spec,
        compiler_params=pltpu.CompilerParams(
            dimension_semantics=("parallel",),
            vmem_limit_bytes=vmem_limit,
        ),
        cost_estimate=pl.CostEstimate(
            flops=flops,
            transcendentals=transcendentals,
            bytes_accessed=bytes_accessed,
        ),
    )(*args)

    if trim_output and latent_dimension != n_out_pad:
        # Inside the jit: a single cheap slice that consumers can fuse with.
        return out_padded[:, :latent_dimension]
    return out_padded


# ----------------------------------------------------------------------------
# User-facing module: one-time param prep + jit'ed forward
# ----------------------------------------------------------------------------
class PallasLatentMLP:
    """LatentMLP with parameters prepared once (padding / casts hoisted)."""

    def __init__(self, weights, biases, *, activation: str,
                 compute_dtype=None, trim_output: bool = True):
        activation = activation.lower()
        if activation not in ("relu", "leakyrelu", "tanh"):
            raise ValueError(f"Unknown activation function '{activation}'")

        weights = [jnp.asarray(w) for w in weights]
        biases = [jnp.asarray(b) for b in biases]
        in_features = weights[0].shape[0]
        latent_dimension = weights[-1].shape[1]
        compute_dtype = (jnp.dtype(compute_dtype) if compute_dtype is not None
                         else weights[0].dtype)

        # Lane (N) dims padded to 128-multiples (dense vst, no masked stores).
        # First-layer K padded only to a sublane multiple of 8; inter-layer K
        # must equal the padded N of the previous layer (h carries that width).
        k0_pad = _round_up(in_features, 8)
        padded_weights, padded_biases = [], []
        prev_pad = k0_pad
        for w, b in zip(weights, biases):
            k, n = w.shape
            n_pad = _round_up(n, 128)
            w_p = jnp.pad(w, ((0, prev_pad - k), (0, n_pad - n)))
            padded_weights.append(w_p.astype(compute_dtype))
            b2 = jnp.reshape(b, (1, -1))
            b_p = jnp.pad(b2, ((0, 0), (0, n_pad - n)))
            padded_biases.append(b_p.astype(jnp.float32))  # cast once, hoisted
            prev_pad = n_pad

        self.in_features = in_features
        self.latent_dimension = latent_dimension
        self.padded_weights = tuple(padded_weights)
        self.padded_biases = tuple(padded_biases)

        self._jit_fwd = jax.jit(functools.partial(
            _latent_mlp_forward_impl,
            activation=activation,
            latent_dimension=latent_dimension,
            k0_pad=k0_pad,
            trim_output=trim_output,
        ))

    def __call__(self, x):
        lead = x.shape[:-1]
        x2 = jnp.reshape(x, (-1, x.shape[-1]))
        out = self._jit_fwd(x2, self.padded_weights, self.padded_biases)
        return jnp.reshape(out, lead + (out.shape[-1],))


# ----------------------------------------------------------------------------
# Deterministic parameter init (mimics nn.Linear default U(-1/sqrt(in), 1/sqrt(in)))
# ----------------------------------------------------------------------------
def init_latent_mlp_params(key, *, in_features: int, latent_dimension: int,
                           num_layers: int, dtype=jnp.float32):
    weights, biases = [], []
    prev = in_features
    for _ in range(num_layers):
        key, kw, kb = jax.random.split(key, 3)
        bound = 1.0 / (prev ** 0.5)
        w = jax.random.uniform(kw, (prev, latent_dimension), dtype,
                               minval=-bound, maxval=bound)
        b = jax.random.uniform(kb, (1, latent_dimension), dtype,
                               minval=-bound, maxval=bound)
        weights.append(w)
        biases.append(b)
        prev = latent_dimension
    return weights, biases


def reference_forward(x, weights, biases, activation):
    h = x.astype(jnp.float32)
    for w, b in zip(weights, biases):
        h = h @ w.astype(jnp.float32) + b.reshape(1, -1).astype(jnp.float32)
        h = _apply_activation(h, activation)
    return h.astype(x.dtype)


# ----------------------------------------------------------------------------
# Main
# ----------------------------------------------------------------------------
if __name__ == "__main__":
    # Module config: in_features=16, latent_dimension=32,
    # config = {'num_layers': 3, 'activation_function': 'leakyrelu'}
    in_features = 16
    latent_dimension = 32
    num_layers = 3
    activation = "leakyrelu"
    batch = 256

    key = jax.random.PRNGKey(0)
    key, kx = jax.random.split(key)
    x = jax.random.normal(kx, (batch, in_features), dtype=jnp.float32)

    weights, biases = init_latent_mlp_params(
        key,
        in_features=in_features,
        latent_dimension=latent_dimension,
        num_layers=num_layers,
    )

    ref = reference_forward(x, weights, biases, activation)

    # Exact f32 path (tight check against the f32 reference chain).
    mlp_f32 = PallasLatentMLP(weights, biases, activation=activation)
    out = jax.block_until_ready(mlp_f32(x))
    assert out.shape == (batch, latent_dimension)
    assert jnp.allclose(out, ref, atol=1e-5, rtol=1e-5), "f32 mismatch vs reference"

    # bf16 MXU-operand fast path (v6e/v7x): bf16 operands, f32 accumulation.
    # Looser tolerance because intermediates round to bf16 between layers.
    mlp_bf16 = PallasLatentMLP(weights, biases, activation=activation,
                               compute_dtype=jnp.bfloat16)
    out_bf16 = jax.block_until_ready(mlp_bf16(x))
    assert out_bf16.shape == (batch, latent_dimension)
    assert jnp.allclose(out_bf16.astype(jnp.float32), ref, atol=1e-1, rtol=1e-1), \
        "bf16 mismatch vs reference"

    print("KERNEL_OK")
</pallas_src>

<mosaic_0001>
module attributes {stable_mosaic.version = 11 : i64} {
  func.func @_latent_mlp_kernel(%arg0: i32, %arg1: memref<256x16xf32, #tpu.memory_space<vmem>>, %arg2: memref<16x128xf32, #tpu.memory_space<vmem>>, %arg3: memref<1x128xf32, #tpu.memory_space<vmem>>, %arg4: memref<128x128xf32, #tpu.memory_space<vmem>>, %arg5: memref<1x128xf32, #tpu.memory_space<vmem>>, %arg6: memref<128x128xf32, #tpu.memory_space<vmem>>, %arg7: memref<1x128xf32, #tpu.memory_space<vmem>>, %arg8: memref<256x128xf32, #tpu.memory_space<vmem>>) attributes {dimension_semantics = [#tpu.dimension_semantics<parallel>], iteration_bounds = array<i64: 1>, scalar_prefetch = 0 : i64, scratch_operands = 0 : i64, tpu.core_type = #tpu.core_type<tc>, window_params = [{transform_indices = @transform_0, window_bounds = array<i64: 256, 16>}, {pipeline_mode = #tpu.pipeline_mode<synchronous>, transform_indices = @transform_1, window_bounds = array<i64: 16, 128>}, {pipeline_mode = #tpu.pipeline_mode<synchronous>, transform_indices = @transform_2, window_bounds = array<i64: 1, 128>}, {pipeline_mode = #tpu.pipeline_mode<synchronous>, transform_indices = @transform_3, window_bounds = array<i64: 128, 128>}, {pipeline_mode = #tpu.pipeline_mode<synchronous>, transform_indices = @transform_4, window_bounds = array<i64: 1, 128>}, {pipeline_mode = #tpu.pipeline_mode<synchronous>, transform_indices = @transform_5, window_bounds = array<i64: 128, 128>}, {pipeline_mode = #tpu.pipeline_mode<synchronous>, transform_indices = @transform_6, window_bounds = array<i64: 1, 128>}, {transform_indices = @transform_7, window_bounds = array<i64: 256, 128>}]} {
    %c0 = arith.constant 0 : index
    %c0_0 = arith.constant 0 : index
    %0 = vector.load %arg1[%c0, %c0_0] : memref<256x16xf32, #tpu.memory_space<vmem>>, vector<256x16xf32>
    %c0_1 = arith.constant 0 : index
    %c0_2 = arith.constant 0 : index
    %1 = vector.load %arg2[%c0_1, %c0_2] : memref<16x128xf32, #tpu.memory_space<vmem>>, vector<16x128xf32>
    %c0_3 = arith.constant 0 : index
    %c0_4 = arith.constant 0 : index
    %2 = vector.load %arg3[%c0_3, %c0_4] : memref<1x128xf32, #tpu.memory_space<vmem>>, vector<1x128xf32>
    %cst = arith.constant dense<0.000000e+00> : vector<256x128xf32>
    %3 = tpu.matmul %0, %1, %cst {dimension_numbers = #tpu.dot_dimension_numbers<[1], [0], [0], [1], [0, 0, 1, 1], [], []>} : vector<256x16xf32>, vector<16x128xf32>, vector<256x128xf32> -> vector<256x128xf32>
    %4 = vector.broadcast %2 : vector<1x128xf32> to vector<256x128xf32>
    %5 = arith.addf %3, %4 : vector<256x128xf32>
    %cst_5 = arith.constant 0.000000e+00 : f32
    %6 = vector.broadcast %cst_5 : f32 to vector<256x128xf32>
    %7 = arith.cmpf oge, %5, %6 : vector<256x128xf32>
    %cst_6 = arith.constant 0.00999999977 : f32
    %8 = vector.broadcast %cst_6 : f32 to vector<256x128xf32>
    %9 = arith.mulf %8, %5 : vector<256x128xf32>
    %10 = arith.select %7, %5, %9 : vector<256x128xi1>, vector<256x128xf32>
    %c0_7 = arith.constant 0 : index
    %c0_8 = arith.constant 0 : index
    %11 = vector.load %arg4[%c0_7, %c0_8] : memref<128x128xf32, #tpu.memory_space<vmem>>, vector<128x128xf32>
    %c0_9 = arith.constant 0 : index
    %c0_10 = arith.constant 0 : index
    %12 = vector.load %arg5[%c0_9, %c0_10] : memref<1x128xf32, #tpu.memory_space<vmem>>, vector<1x128xf32>
    %cst_11 = arith.constant dense<0.000000e+00> : vector<256x128xf32>
    %13 = tpu.matmul %10, %11, %cst_11 {dimension_numbers = #tpu.dot_dimension_numbers<[1], [0], [0], [1], [0, 0, 1, 1], [], []>} : vector<256x128xf32>, vector<128x128xf32>, vector<256x128xf32> -> vector<256x128xf32>
    %14 = vector.broadcast %12 : vector<1x128xf32> to vector<256x128xf32>
    %15 = arith.addf %13, %14 : vector<256x128xf32>
    %cst_12 = arith.constant 0.000000e+00 : f32
    %16 = vector.broadcast %cst_12 : f32 to vector<256x128xf32>
    %17 = arith.cmpf oge, %15, %16 : vector<256x128xf32>
    %cst_13 = arith.constant 0.00999999977 : f32
    %18 = vector.broadcast %cst_13 : f32 to vector<256x128xf32>
    %19 = arith.mulf %18, %15 : vector<256x128xf32>
    %20 = arith.select %17, %15, %19 : vector<256x128xi1>, vector<256x128xf32>
    %c0_14 = arith.constant 0 : index
    %c0_15 = arith.constant 0 : index
    %21 = vector.load %arg6[%c0_14, %c0_15] : memref<128x128xf32, #tpu.memory_space<vmem>>, vector<128x128xf32>
    %c0_16 = arith.constant 0 : index
    %c0_17 = arith.constant 0 : index
    %22 = vector.load %arg7[%c0_16, %c0_17] : memref<1x128xf32, #tpu.memory_space<vmem>>, vector<1x128xf32>
    %cst_18 = arith.constant dense<0.000000e+00> : vector<256x128xf32>
    %23 = tpu.matmul %20, %21, %cst_18 {dimension_numbers = #tpu.dot_dimension_numbers<[1], [0], [0], [1], [0, 0, 1, 1], [], []>} : vector<256x128xf32>, vector<128x128xf32>, vector<256x128xf32> -> vector<256x128xf32>
    %24 = vector.broadcast %22 : vector<1x128xf32> to vector<256x128xf32>
    %25 = arith.addf %23, %24 : vector<256x128xf32>
    %cst_19 = arith.constant 0.000000e+00 : f32
    %26 = vector.broadcast %cst_19 : f32 to vector<256x128xf32>
    %27 = arith.cmpf oge, %25, %26 : vector<256x128xf32>
    %cst_20 = arith.constant 0.00999999977 : f32
    %28 = vector.broadcast %cst_20 : f32 to vector<256x128xf32>
    %29 = arith.mulf %28, %25 : vector<256x128xf32>
    %30 = arith.select %27, %25, %29 : vector<256x128xi1>, vector<256x128xf32>
    %c0_21 = arith.constant 0 : index
    %c0_22 = arith.constant 0 : index
    %31 = vector.load %arg8[%c0_21, %c0_22] : memref<256x128xf32, #tpu.memory_space<vmem>>, vector<256x128xf32>
    tpu.vector_store %arg8[%c0_21, %c0_22], %30 {strides = array<i32>} : memref<256x128xf32, #tpu.memory_space<vmem>>, vector<256x128xf32>,
    return
  }
  func.func @transform_0(%arg0: i32) -> (i32, i32) {
    %c0_i32 = arith.constant 0 : i32
    %c0_i32_0 = arith.constant 0 : i32
    return %arg0, %c0_i32 : i32, i32
  }
  func.func @transform_1(%arg0: i32) -> (i32, i32) {
    %c0_i32 = arith.constant 0 : i32
    %c0_i32_0 = arith.constant 0 : i32
    %c0_i32_1 = arith.constant 0 : i32
    return %c0_i32, %c0_i32_0 : i32, i32
  }
  func.func @transform_2(%arg0: i32) -> (i32, i32) {
    %c0_i32 = arith.constant 0 : i32
    %c0_i32_0 = arith.constant 0 : i32
    %c0_i32_1 = arith.constant 0 : i32
    return %c0_i32, %c0_i32_0 : i32, i32
  }
  func.func @transform_3(%arg0: i32) -> (i32, i32) {
    %c0_i32 = arith.constant 0 : i32
    %c0_i32_0 = arith.constant 0 : i32
    %c0_i32_1 = arith.constant 0 : i32
    return %c0_i32, %c0_i32_0 : i32, i32
  }
  func.func @transform_4(%arg0: i32) -> (i32, i32) {
    %c0_i32 = arith.constant 0 : i32
    %c0_i32_0 = arith.constant 0 : i32
    %c0_i32_1 = arith.constant 0 : i32
    return %c0_i32, %c0_i32_0 : i32, i32
  }
  func.func @transform_5(%arg0: i32) -> (i32, i32) {
    %c0_i32 = arith.constant 0 : i32
    %c0_i32_0 = arith.constant 0 : i32
    %c0_i32_1 = arith.constant 0 : i32
    return %c0_i32, %c0_i32_0 : i32, i32
  }
  func.func @transform_6(%arg0: i32) -> (i32, i32) {
    %c0_i32 = arith.constant 0 : i32
    %c0_i32_0 = arith.constant 0 : i32
    %c0_i32_1 = arith.constant 0 : i32
    return %c0_i32, %c0_i32_0 : i32, i32
  }
  func.func @transform_7(%arg0: i32) -> (i32, i32) {
    %c0_i32 = arith.constant 0 : i32
    %c0_i32_0 = arith.constant 0 : i32
    return %arg0, %c0_i32 : i32, i32
  }
}

</mosaic_0001>

<bundles_post_ra>
// kernel: _latent_mlp_forward_impl.1
= control target key start
LH: loop header
LB: loop body
LE: loop exit
PB: predicated region body
PF: predicated region fallthrough
CT: control target
= control target key end

     0   :  { %vm67_vm0 = vcmask 130048   ;;  %s2091_s1 = inlined_call_operand.vmem [shape: f32[16,128], index: 1, kind: input, shape index: {}]   ;;  %s2092_s0 = inlined_call_operand.vmem [shape: f32[256,16], index: 0, kind: input, shape index: {}]   ;;  %s2093_s3 = inlined_call_operand.vmem [shape: f32[128,128], index: 3, kind: input, shape index: {}]   ;;  %s2094_s5 = inlined_call_operand.vmem [shape: f32[128,128], index: 5, kind: input, shape index: {}]   ;;  %s2095_s2 = inlined_call_operand.vmem [shape: f32[1,128], index: 2, kind: input, shape index: {}]   ;;  %s2096_s4 = inlined_call_operand.vmem [shape: f32[1,128], index: 4, kind: input, shape index: {}]   ;;  %s2097_s6 = inlined_call_operand.vmem [shape: f32[1,128], index: 6, kind: input, shape index: {}]   ;;  %s2098_s7 = inlined_call_operand.vmem [shape: f32[256,128], index: 7, kind: output, shape index: {}]  }
   0x1   :  { %v59_v0 = vld [vmem:[%s2091_s1 + $0x8] sm:$0xff]  ;;  %v58_v1 = vld [vmem:[%s2091_s1] sm:$0xff]  ;;  %v28_v4 = vld [vmem:[%s2092_s0 + $0x10] sm:$0xff] }
   0x2   :  { %v26_v2 = vld [vmem:[%s2092_s0] sm:$0xff]  ;;  %1374 = vmatprep.subr.mxu0 %v59_v0  ;;  %v27_v3 = vld [vmem:[%s2092_s0 + $0x8] sm:$0xff]  ;;  %1586 = vmatprep.subr.mxu1 %v59_v0  ;;  %v29_v6 = vld [vmem:[%s2092_s0 + $0x18] sm:$0xff] }
   0x3   :  { %1378 = vmatprep.mubr.msk.f32.mxu0 %vm67_vm0, %v26_v2  ;;  %1375 = vmatpush3.msra.mxu0 %v59_v0  ;;  %v42_v5 = vld [vmem:[%s2092_s0 + $0x80] sm:$0xff]  ;;  %v43_v7 = vld [vmem:[%s2092_s0 + $0x88] sm:$0xff]  ;;  %v44_v8 = vld [vmem:[%s2092_s0 + $0x90] sm:$0xff] }
   0x4   :  { %1376 = vmatprep.subr.mxu0 %v58_v1  ;;  %1588 = vmatpush3.msra.mxu1 %v59_v0  ;;  %v30_v9 = vld [vmem:[%s2092_s0 + $0x20] sm:$0xff]  ;;  %v45_v10 = vld [vmem:[%s2092_s0 + $0x98] sm:$0xff]  ;;  %v31_v12 = vld [vmem:[%s2092_s0 + $0x28] sm:$0xff] }
   0x5   :  { %1377 = vmatpush3.msra.mxu0 %v58_v1  ;;  %1587 = vmatprep.subr.mxu1 %v58_v1  ;;  %v46_v11 = vld [vmem:[%s2092_s0 + $0xa0] sm:$0xff]  ;;  %v32_v13 = vld [vmem:[%s2092_s0 + $0x30] sm:$0xff]  ;;  %v500_v14 = vld [vmem:[%s2093_s3 + $0x78] sm:$0xff] }
   0x6   :  { %1379 = vmatmul.mubr.msk.f32.vlgmr.msra.gmra.mxu0 %vm67_vm0, %v27_v3  ;;  %1589 = vmatpush3.msra.mxu1 %v58_v1  ;;  %v499_v15 = vld [vmem:[%s2093_s3 + $0x70] sm:$0xff]  ;;  %v47_v16 = vld [vmem:[%s2092_s0 + $0xa8] sm:$0xff]  ;;  %v33_v18 = vld [vmem:[%s2092_s0 + $0x38] sm:$0xff] }
   0x7   :  { %1381 = vmatprep.mubr.msk.f32.mxu0 %vm67_vm0, %v28_v4  ;;  %1402 = vmatprep.mubr.msk.f32.mxu1 %vm67_vm0, %v42_v5  ;;  %v48_v17 = vld [vmem:[%s2092_s0 + $0xb0] sm:$0xff]  ;;  %v498_v19 = vld [vmem:[%s2093_s3 + $0x68] sm:$0xff]  ;;  %v34_v20 = vld [vmem:[%s2092_s0 + $0x40] sm:$0xff] }
   0x8   :  { %1403 = vmatmul.mubr.msk.f32.vlgmr.msra.gmra.mxu1 %vm67_vm0, %v43_v7  ;;  %1426 = vmatprep.subr.mxu1 %v500_v14  ;;  %v49_v21 = vld [vmem:[%s2092_s0 + $0xb8] sm:$0xff]  ;;  %v497_v22 = vld [vmem:[%s2093_s3 + $0x60] sm:$0xff]  ;;  %v35_v24 = vld [vmem:[%s2092_s0 + $0x48] sm:$0xff] }
   0x9   :  { %1405 = vmatprep.mubr.msk.f32.mxu1 %vm67_vm0, %v44_v8  ;;  %1427 = vmatpush3.msra.mxu1 %v500_v14  ;;  %v50_v23 = vld [vmem:[%s2092_s0 + $0xc0] sm:$0xff]  ;;  %v496_v25 = vld [vmem:[%s2093_s3 + $0x58] sm:$0xff]  ;;  %v36_v26 = vld [vmem:[%s2092_s0 + $0x50] sm:$0xff] }
   0xa   :  { %1382 = vmatmul.mubr.msk.f32.gmra.mxu0 %vm67_vm0, %v29_v6  ;;  %1428 = vmatprep.subr.mxu1 %v499_v15  ;;  %v51_v27 = vld [vmem:[%s2092_s0 + $0xc8] sm:$0xff]  ;;  %v495_v28 = vld [vmem:[%s2093_s3 + $0x50] sm:$0xff]  ;;  %v37_v30 = vld [vmem:[%s2092_s0 + $0x58] sm:$0xff] }
   0xb   :  { %1384 = vmatprep.mubr.msk.f32.mxu0 %vm67_vm0, %v30_v9  ;;  %1429 = vmatpush3.msra.mxu1 %v499_v15  ;;  %v52_v29 = vld [vmem:[%s2092_s0 + $0xd0] sm:$0xff]  ;;  %v494_v31 = vld [vmem:[%s2093_s3 + $0x48] sm:$0xff]  ;;  %v38_v32 = vld [vmem:[%s2092_s0 + $0x60] sm:$0xff] }
   0xc   :  { %1406 = vmatmul.mubr.msk.f32.gmra.mxu1 %vm67_vm0, %v45_v10  ;;  %1430 = vmatprep.subr.mxu1 %v498_v19  ;;  %v53_v33 = vld [vmem:[%s2092_s0 + $0xd8] sm:$0xff]  ;;  %v493_v34 = vld [vmem:[%s2093_s3 + $0x40] sm:$0xff]  ;;  %v39_v36 = vld [vmem:[%s2092_s0 + $0x68] sm:$0xff] }
   0xd   :  { %1408 = vmatprep.mubr.msk.f32.mxu1 %vm67_vm0, %v46_v11  ;;  %1431 = vmatpush3.msra.mxu1 %v498_v19  ;;  %v54_v35 = vld [vmem:[%s2092_s0 + $0xe0] sm:$0xff]  ;;  %v492_v37 = vld [vmem:[%s2093_s3 + $0x38] sm:$0xff]  ;;  %v40_v38 = vld [vmem:[%s2092_s0 + $0x70] sm:$0xff] }
   0xe   :  { %1385 = vmatmul.mubr.msk.f32.gmra.mxu0 %vm67_vm0, %v31_v12  ;;  %1432 = vmatprep.subr.mxu1 %v497_v22  ;;  %v55_v39 = vld [vmem:[%s2092_s0 + $0xe8] sm:$0xff]  ;;  %v491_v40 = vld [vmem:[%s2093_s3 + $0x30] sm:$0xff]  ;;  %v41_v42 = vld [vmem:[%s2092_s0 + $0x78] sm:$0xff] }
   0xf   :  { %1387 = vmatprep.mubr.msk.f32.mxu0 %vm67_vm0, %v32_v13  ;;  %1433 = vmatpush3.msra.mxu1 %v497_v22  ;;  %v56_v41 = vld [vmem:[%s2092_s0 + $0xf0] sm:$0xff]  ;;  %v490_v43 = vld [vmem:[%s2093_s3 + $0x28] sm:$0xff]  ;;  %v57_v44 = vld [vmem:[%s2092_s0 + $0xf8] sm:$0xff] }
  0x10   :  { %1409 = vmatmul.mubr.msk.f32.gmra.mxu1 %vm67_vm0, %v47_v16  ;;  %1434 = vmatprep.subr.mxu1 %v496_v25  ;;  %v489_v45 = vld [vmem:[%s2093_s3 + $0x20] sm:$0xff]  ;;  %v488_v46 = vld [vmem:[%s2093_s3 + $0x18] sm:$0xff]  ;;  %v487_v47 = vld [vmem:[%s2093_s3 + $0x10] sm:$0xff] }
  0x11   :  { %1411 = vmatprep.mubr.msk.f32.mxu1 %vm67_vm0, %v48_v17  ;;  %1435 = vmatpush3.msra.mxu1 %v496_v25  ;;  %v486_v48 = vld [vmem:[%s2093_s3 + $0x8] sm:$0xff]  ;;  %v485_v49 = vld [vmem:[%s2093_s3] sm:$0xff]  ;;  %v844_v50 = vld [vmem:[%s2094_s5 + $0x78] sm:$0xff] }
  0x12   :  { %1388 = vmatmul.mubr.msk.f32.gmra.mxu0 %vm67_vm0, %v33_v18  ;;  %1436 = vmatprep.subr.mxu1 %v495_v28  ;;  %v843_v51 = vld [vmem:[%s2094_s5 + $0x70] sm:$0xff]  ;;  %v842_v52 = vld [vmem:[%s2094_s5 + $0x68] sm:$0xff]  ;;  %v841_v53 = vld [vmem:[%s2094_s5 + $0x60] sm:$0xff] }
  0x13   :  { %1390 = vmatprep.mubr.msk.f32.mxu0 %vm67_vm0, %v34_v20  ;;  %1437 = vmatpush3.msra.mxu1 %v495_v28  ;;  %v840_v54 = vld [vmem:[%s2094_s5 + $0x58] sm:$0xff]  ;;  %v839_v55 = vld [vmem:[%s2094_s5 + $0x50] sm:$0xff]  ;;  %v838_v56 = vld [vmem:[%s2094_s5 + $0x48] sm:$0xff] }
  0x14   :  { %1412 = vmatmul.mubr.msk.f32.gmra.mxu1 %vm67_vm0, %v49_v21  ;;  %1438 = vmatprep.subr.mxu1 %v494_v31  ;;  %v837_v57 = vld [vmem:[%s2094_s5 + $0x40] sm:$0xff]  ;;  %v836_v58 = vld [vmem:[%s2094_s5 + $0x38] sm:$0xff]  ;;  %v835_v59 = vld [vmem:[%s2094_s5 + $0x30] sm:$0xff] }
  0x15   :  { %1414 = vmatprep.mubr.msk.f32.mxu1 %vm67_vm0, %v50_v23  ;;  %1439 = vmatpush3.msra.mxu1 %v494_v31  ;;  %v834_v60 = vld [vmem:[%s2094_s5 + $0x28] sm:$0xff]  ;;  %v833_v61 = vld [vmem:[%s2094_s5 + $0x20] sm:$0xff] }
  0x16   :  { %1391 = vmatmul.mubr.msk.f32.gmra.mxu0 %vm67_vm0, %v35_v24  ;;  %1440 = vmatprep.subr.mxu1 %v493_v34  ;;  %v1851_v62 = vld [vmem:[%s2095_s2] ss:$0 sm:$0xff] }
  0x17   :  { %1393 = vmatprep.mubr.msk.f32.mxu0 %vm67_vm0, %v36_v26  ;;  %1441 = vmatpush3.msra.mxu1 %v493_v34 }
  0x18   :  { %1415 = vmatmul.mubr.msk.f32.gmra.mxu1 %vm67_vm0, %v51_v27  ;;  %1442 = vmatprep.subr.mxu1 %v492_v37 }
  0x19   :  { %1417 = vmatprep.mubr.msk.f32.mxu1 %vm67_vm0, %v52_v29  ;;  %1443 = vmatpush3.msra.mxu1 %v492_v37 }
  0x1a   :  { %1394 = vmatmul.mubr.msk.f32.gmra.mxu0 %vm67_vm0, %v37_v30  ;;  %1444 = vmatprep.subr.mxu1 %v491_v40 }
  0x1b   :  { %1396 = vmatprep.mubr.msk.f32.mxu0 %vm67_vm0, %v38_v32  ;;  %1445 = vmatpush3.msra.mxu1 %v491_v40 }
  0x1c   :  { %1418 = vmatmul.mubr.msk.f32.gmra.mxu1 %vm67_vm0, %v53_v33  ;;  %1446 = vmatprep.subr.mxu1 %v490_v43 }
  0x1d   :  { %1420 = vmatprep.mubr.msk.f32.mxu1 %vm67_vm0, %v54_v35  ;;  %1447 = vmatpush3.msra.mxu1 %v490_v43 }
  0x1e   :  { %1397 = vmatmul.mubr.msk.f32.gmra.mxu0 %vm67_vm0, %v39_v36  ;;  %1448 = vmatprep.subr.mxu1 %v489_v45 }
  0x1f   :  { %1399 = vmatprep.mubr.msk.f32.mxu0 %vm67_vm0, %v40_v38  ;;  %1449 = vmatpush3.msra.mxu1 %v489_v45 }
  0x20   :  { %1421 = vmatmul.mubr.msk.f32.gmra.mxu1 %vm67_vm0, %v55_v39  ;;  %1450 = vmatprep.subr.mxu1 %v488_v46 }
  0x21   :  { %1423 = vmatprep.mubr.msk.f32.mxu1 %vm67_vm0, %v56_v41  ;;  %1451 = vmatpush3.msra.mxu1 %v488_v46 }
  0x22   :  { %1400 = vmatmul.mubr.msk.f32.gmra.mxu0 %vm67_vm0, %v41_v42  ;;  %1452 = vmatprep.subr.mxu1 %v487_v47 }
  0x23   :  { %1453 = vmatpush3.msra.mxu1 %v487_v47  ;;  %1506 = vmatprep.subr.mxu0 %v844_v50 }
  0x24   :  { %1424 = vmatmul.mubr.msk.f32.gmra.mxu1 %vm67_vm0, %v57_v44  ;;  %1454 = vmatprep.subr.mxu1 %v486_v48 }
  0x25   :  { %1455 = vmatpush3.msra.mxu1 %v486_v48  ;;  %1507 = vmatpush3.msra.mxu0 %v844_v50 }
  0x26   :  { %1456 = vmatprep.subr.mxu1 %v485_v49  ;;  %1508 = vmatprep.subr.mxu0 %v843_v51 }
  0x27   :  { %1457 = vmatpush3.msra.mxu1 %v485_v49  ;;  %1509 = vmatpush3.msra.mxu0 %v843_v51 }
  0x28   :  { %1510 = vmatprep.subr.mxu0 %v842_v52 }
  0x29   :  { %1511 = vmatpush3.msra.mxu0 %v842_v52 }
  0x2a   :  { %1512 = vmatprep.subr.mxu0 %v841_v53 }
  0x2b   :  { %1513 = vmatpush3.msra.mxu0 %v841_v53 }
  0x2c   :  { %1514 = vmatprep.subr.mxu0 %v840_v54 }
  0x2d   :  { %1515 = vmatpush3.msra.mxu0 %v840_v54 }
  0x2e   :  { %1516 = vmatprep.subr.mxu0 %v839_v55 }
  0x2f   :  { %1517 = vmatpush3.msra.mxu0 %v839_v55 }
  0x30   :  { %1518 = vmatprep.subr.mxu0 %v838_v56 }
  0x31   :  { %1519 = vmatpush3.msra.mxu0 %v838_v56 }
  0x32   :  { %1520 = vmatprep.subr.mxu0 %v837_v57 }
  0x33   :  { %1521 = vmatpush3.msra.mxu0 %v837_v57 }
  0x34   :  { %1522 = vmatprep.subr.mxu0 %v836_v58 }
  0x35   :  { %1523 = vmatpush3.msra.mxu0 %v836_v58 }
  0x36   :  { %1524 = vmatprep.subr.mxu0 %v835_v59 }
  0x37   :  { %1525 = vmatpush3.msra.mxu0 %v835_v59 }
  0x38   :  { %1526 = vmatprep.subr.mxu0 %v834_v60 }
  0x39   :  { %1527 = vmatpush3.msra.mxu0 %v834_v60 }
  0x3a   :  { %1528 = vmatprep.subr.mxu0 %v833_v61 }
  0x3b   :  { %1529 = vmatpush3.msra.mxu0 %v833_v61 }
  0xc6   :  { %v1380_v63 = vpop.f32.mrf.mxu0 }
  0xc7   :  { %v236_v0 = vadd.f32 %v1380_v63, %v1851_v62 }
  0xc8   :  { %v230_v1 = vpop.f32.mrf.mxu0  ;;  %v1854_v2 = vpop.f32.mrf.mxu1 }
  0xc9   :  { %v231_v3 = vadd.f32 %v1851_v62, %v230_v1  ;;  %v422_v4 = vmul.f32 0.01, %v236_v0  ;;  %vm390_vm1 = vcmp.ge.f32.partialorder %v236_v0, 0.0 }
  0xca   :  { %v1383_v5 = vpop.f32.mrf.mxu0  ;;  %v1857_v6 = vpop.f32.mrf.mxu1 }
  0xcb   :  { %v421_v7 = vmul.f32 0.01, %v231_v3  ;;  %v246_v8 = vadd.f32 %v1383_v5, %v1851_v62  ;;  %vm389_vm2 = vcmp.ge.f32.partialorder %v231_v3, 0.0  ;;  %v454_v13 = vsel %vm390_vm1, %v236_v0, %v422_v4 }
  0xcc   :  { %v240_v9 = vpop.f32.mrf.mxu0  ;;  %v1860_v10 = vpop.f32.mrf.mxu1  ;;  %v311_v63 = vadd.f32 %v1851_v62, %v1857_v6 }
  0xcd   :  { %v241_v11 = vadd.f32 %v1851_v62, %v240_v9  ;;  %v453_v12 = vsel %vm389_vm2, %v231_v3, %v421_v7  ;;  %v424_v14 = vmul.f32 0.01, %v246_v8  ;;  %vm392_vm4 = vcmp.ge.f32.partialorder %v246_v8, 0.0 }
  0xce   :  { %v1386_v15 = vpop.f32.mrf.mxu0  ;;  %1458 = vmatprep.mubr.f32.mxu1 %v453_v12  ;;  %v1863_v16 = vpop.f32.mrf.mxu1  ;;  %v316_v9 = vadd.f32 %v1854_v2, %v1851_v62  ;;  %vm405_vm1 = vcmp.ge.f32.partialorder %v311_v63, 0.0 }
  0xcf   :  { %v423_v17 = vmul.f32 0.01, %v241_v11  ;;  %v256_v18 = vadd.f32 %v1386_v15, %v1851_v62  ;;  %1459 = vmatmul.mubr.f32.vlgmr.msra.gmra.mxu1 %v454_v13  ;;  %vm391_vm3 = vcmp.ge.f32.partialorder %v241_v11, 0.0  ;;  %v456_v25 = vsel %vm392_vm4, %v246_v8, %v424_v14 }
  0xd0   :  { %v250_v19 = vpop.f32.mrf.mxu0  ;;  %v1866_v20 = vpop.f32.mrf.mxu1  ;;  %v321_v6 = vadd.f32 %v1851_v62, %v1863_v16  ;;  %vm406_vm2 = vcmp.ge.f32.partialorder %v316_v9, 0.0 }
  0xd1   :  { %v251_v21 = vadd.f32 %v1851_v62, %v250_v19  ;;  %v455_v22 = vsel %vm391_vm3, %v241_v11, %v423_v17  ;;  %v426_v23 = vmul.f32 0.01, %v256_v18  ;;  %vm394_vm6 = vcmp.ge.f32.partialorder %v256_v18, 0.0 }
  0xd2   :  { %v1389_v24 = vpop.f32.mrf.mxu0  ;;  %1461 = vmatprep.mubr.f32.mxu1 %v455_v22  ;;  %v1870_v29 = vpop.f32.mrf.mxu1  ;;  %v437_v11 = vmul.f32 0.01, %v311_v63  ;;  %v438_v17 = vmul.f32 0.01, %v316_v9  ;;  %v439_v2 = vmul.f32 0.01, %v321_v6 }
  0xd3   :  { %v425_v26 = vmul.f32 0.01, %v251_v21  ;;  %v266_v27 = vadd.f32 %v1389_v24, %v1851_v62  ;;  %1462 = vmatmul.mubr.f32.gmra.mxu1 %v456_v25  ;;  %vm393_vm5 = vcmp.ge.f32.partialorder %v251_v21, 0.0  ;;  %v458_v34 = vsel %vm394_vm6, %v256_v18, %v426_v23 }
  0xd4   :  { %v260_v28 = vpop.f32.mrf.mxu0  ;;  %v1874_v38 = vpop.f32.mrf.mxu1  ;;  %v326_v18 = vadd.f32 %v1860_v10, %v1851_v62  ;;  %v469_v22 = vsel %vm405_vm1, %v311_v63, %v437_v11  ;;  %vm407_vm3 = vcmp.ge.f32.partialorder %v321_v6, 0.0  ;;  %v336_v24 = vadd.f32 %v1866_v20, %v1851_v62 }
  0xd5   :  { %v261_v30 = vadd.f32 %v1851_v62, %v260_v28  ;;  %v457_v31 = vsel %vm393_vm5, %v251_v21, %v425_v26  ;;  %v428_v32 = vmul.f32 0.01, %v266_v27  ;;  %vm396_vm8 = vcmp.ge.f32.partialorder %v266_v27, 0.0 }
  0xd6   :  { %v1392_v33 = vpop.f32.mrf.mxu0  ;;  %1464 = vmatprep.mubr.f32.mxu1 %v457_v31  ;;  %v340_v47 = vpop.f32.mrf.mxu1  ;;  %v331_v21 = vadd.f32 %v1851_v62, %v1870_v29  ;;  %v440_v23 = vmul.f32 0.01, %v326_v18  ;;  %v470_v25 = vsel %vm406_vm2, %v316_v9, %v438_v17  ;;  %vm408_vm4 = vcmp.ge.f32.partialorder %v326_v18, 0.0 }
  0xd7   :  { %v427_v35 = vmul.f32 0.01, %v261_v30  ;;  %v276_v36 = vadd.f32 %v1392_v33, %v1851_v62  ;;  %1465 = vmatmul.mubr.f32.gmra.mxu1 %v458_v34  ;;  %vm395_vm7 = vcmp.ge.f32.partialorder %v261_v30, 0.0  ;;  %v460_v43 = vsel %vm396_vm8, %v266_v27, %v428_v32 }
  0xd8   :  { %v270_v37 = vpop.f32.mrf.mxu0  ;;  %v1880_v56 = vpop.f32.mrf.mxu1  ;;  %v441_v26 = vmul.f32 0.01, %v331_v21  ;;  %v341_v10 = vadd.f32 %v1851_v62, %v340_v47  ;;  %v471_v27 = vsel %vm407_vm3, %v321_v6, %v439_v2  ;;  %vm409_vm5 = vcmp.ge.f32.partialorder %v331_v21, 0.0 }
  0xd9   :  { %v271_v39 = vadd.f32 %v1851_v62, %v270_v37  ;;  %v459_v40 = vsel %vm395_vm7, %v261_v30, %v427_v35  ;;  %v430_v41 = vmul.f32 0.01, %v276_v36  ;;  %vm398_vm10 = vcmp.ge.f32.partialorder %v276_v36, 0.0 }
  0xda   :  { %v1395_v42 = vpop.f32.mrf.mxu0  ;;  %1467 = vmatprep.mubr.f32.mxu1 %v459_v40  ;;  %v350_v4 = vpop.f32.mrf.mxu1  ;;  %v442_v29 = vmul.f32 0.01, %v336_v24  ;;  %v346_v30 = vadd.f32 %v1874_v38, %v1851_v62  ;;  %v472_v31 = vsel %vm408_vm4, %v326_v18, %v440_v23  ;;  %v443_v32 = vmul.f32 0.01, %v341_v10 }
  0xdb   :  { %v429_v44 = vmul.f32 0.01, %v271_v39  ;;  %v286_v45 = vadd.f32 %v1395_v42, %v1851_v62  ;;  %1468 = vmatmul.mubr.f32.gmra.mxu1 %v460_v43  ;;  %vm397_vm9 = vcmp.ge.f32.partialorder %v271_v39, 0.0  ;;  %v462_v52 = vsel %vm398_vm10, %v276_v36, %v430_v41 }
  0xdc   :  { %v280_v46 = vpop.f32.mrf.mxu0  ;;  %v1419_v14 = vpop.f32.mrf.mxu1  ;;  %v351_v33 = vadd.f32 %v1851_v62, %v350_v4  ;;  %v473_v20 = vsel %vm409_vm5, %v331_v21, %v441_v26  ;;  %vm410_vm6 = vcmp.ge.f32.partialorder %v336_v24, 0.0  ;;  %vm411_vm7 = vcmp.ge.f32.partialorder %v341_v10, 0.0  ;;  %v829_v4 = vld [vmem:[%s2094_s5] sm:$0xff] }
  0xdd   :  { %v281_v48 = vadd.f32 %v1851_v62, %v280_v46  ;;  %v461_v49 = vsel %vm397_vm9, %v271_v39, %v429_v44  ;;  %v432_v50 = vmul.f32 0.01, %v286_v45  ;;  %vm400_vm12 = vcmp.ge.f32.partialorder %v286_v45, 0.0 }
  0xde   :  { %v1398_v51 = vpop.f32.mrf.mxu0  ;;  %1470 = vmatprep.mubr.f32.mxu1 %v461_v49  ;;  %v360_v16 = vpop.f32.mrf.mxu1  ;;  %v444_v35 = vmul.f32 0.01, %v346_v30  ;;  %v356_v36 = vadd.f32 %v1880_v56, %v1851_v62  ;;  %v474_v37 = vsel %vm410_vm6, %v336_v24, %v442_v29  ;;  %v445_v39 = vmul.f32 0.01, %v351_v33 }
  0xdf   :  { %v431_v53 = vmul.f32 0.01, %v281_v48  ;;  %v296_v54 = vadd.f32 %v1398_v51, %v1851_v62  ;;  %1471 = vmatmul.mubr.f32.gmra.mxu1 %v462_v52  ;;  %vm399_vm11 = vcmp.ge.f32.partialorder %v281_v48, 0.0  ;;  %v464_v61 = vsel %vm400_vm12, %v286_v45, %v432_v50 }
  0xe0   :  { %v290_v55 = vpop.f32.mrf.mxu0  ;;  %v1422_v28 = vpop.f32.mrf.mxu1  ;;  %v361_v40 = vadd.f32 %v1851_v62, %v360_v16  ;;  %v475_v38 = vsel %vm411_vm7, %v341_v10, %v443_v32  ;;  %vm412_vm8 = vcmp.ge.f32.partialorder %v346_v30, 0.0  ;;  %vm413_vm9 = vcmp.ge.f32.partialorder %v351_v33, 0.0 }
  0xe1   :  { %v291_v57 = vadd.f32 %v1851_v62, %v290_v55  ;;  %v463_v58 = vsel %vm399_vm11, %v281_v48, %v431_v53  ;;  %v434_v59 = vmul.f32 0.01, %v296_v54  ;;  %vm402_vm14 = vcmp.ge.f32.partialorder %v296_v54, 0.0 }
  0xe2   :  { %v1401_v60 = vpop.f32.mrf.mxu0  ;;  %1473 = vmatprep.mubr.f32.mxu1 %v463_v58  ;;  %v370_v34 = vpop.f32.mrf.mxu1  ;;  %v446_v42 = vmul.f32 0.01, %v356_v36  ;;  %v366_v43 = vadd.f32 %v1419_v14, %v1851_v62  ;;  %v476_v44 = vsel %vm412_vm8, %v346_v30, %v444_v35  ;;  %v447_v45 = vmul.f32 0.01, %v361_v40 }
  0xe3   :  { %v433_v0 = vmul.f32 0.01, %v291_v57  ;;  %v306_v1 = vadd.f32 %v1401_v60, %v1851_v62  ;;  %1474 = vmatmul.mubr.f32.gmra.mxu1 %v464_v61  ;;  %vm401_vm13 = vcmp.ge.f32.partialorder %v291_v57, 0.0  ;;  %v466_v12 = vsel %vm402_vm14, %v296_v54, %v434_v59 }
  0xe4   :  { %v300_v3 = vpop.f32.mrf.mxu0  ;;  %v1425_v41 = vpop.f32.mrf.mxu1  ;;  %v371_v46 = vadd.f32 %v1851_v62, %v370_v34  ;;  %v477_v47 = vsel %vm413_vm9, %v351_v33, %v445_v39  ;;  %vm414_vm10 = vcmp.ge.f32.partialorder %v356_v36, 0.0  ;;  %vm415_vm11 = vcmp.ge.f32.partialorder %v361_v40, 0.0 }
  0xe5   :  { %v301_v5 = vadd.f32 %v1851_v62, %v300_v3  ;;  %v465_v7 = vsel %vm401_vm13, %v291_v57, %v433_v0  ;;  %v436_v8 = vmul.f32 0.01, %v306_v1  ;;  %vm404_vm0 = vcmp.ge.f32.partialorder %v306_v1, 0.0  ;;  %v830_v3 = vld [vmem:[%s2094_s5 + $0x8] sm:$0xff] }
  0xe6   :  { %1476 = vmatprep.mubr.f32.mxu1 %v465_v7  ;;  %v380_v48 = vpop.f32.mrf.mxu1  ;;  %v448_v49 = vmul.f32 0.01, %v366_v43  ;;  %v376_v50 = vadd.f32 %v1422_v28, %v1851_v62  ;;  %v478_v51 = vsel %vm414_vm10, %v356_v36, %v446_v42  ;;  %v449_v52 = vmul.f32 0.01, %v371_v46 }
  0xe7   :  { %v435_v13 = vmul.f32 0.01, %v301_v5  ;;  %1477 = vmatmul.mubr.f32.gmra.mxu1 %v466_v12  ;;  %vm403_vm15 = vcmp.ge.f32.partialorder %v301_v5, 0.0  ;;  %v468_v19 = vsel %vm404_vm0, %v306_v1, %v436_v8  ;;  %v381_v53 = vadd.f32 %v1851_v62, %v380_v48  ;;  %v832_v1 = vld [vmem:[%s2094_s5 + $0x18] sm:$0xff] }
  0xe8   :  { %v479_v54 = vsel %vm415_vm11, %v361_v40, %v447_v45  ;;  %vm416_vm12 = vcmp.ge.f32.partialorder %v366_v43, 0.0  ;;  %vm417_vm13 = vcmp.ge.f32.partialorder %v371_v46, 0.0  ;;  %v450_v55 = vmul.f32 0.01, %v376_v50  ;;  %1530 = vmatprep.subr.mxu0 %v832_v1 }
  0xe9   :  { %v467_v15 = vsel %vm403_vm15, %v301_v5, %v435_v13  ;;  %v386_v56 = vadd.f32 %v1425_v41, %v1851_v62  ;;  %v480_v57 = vsel %vm416_vm12, %v366_v43, %v448_v49  ;;  %v451_v58 = vmul.f32 0.01, %v381_v53  ;;  %1531 = vmatpush3.msra.mxu0 %v832_v1  ;;  %v831_v62 = vld [vmem:[%s2094_s5 + $0x10] sm:$0xff]  ;;  %v1924_v5 = vld [vmem:[%s2096_s4] ss:$0 sm:$0xff] }
  0xea   :  { %1479 = vmatprep.mubr.f32.mxu1 %v467_v15  ;;  %v481_v59 = vsel %vm417_vm13, %v371_v46, %v449_v52  ;;  %vm418_vm14 = vcmp.ge.f32.partialorder %v376_v50, 0.0  ;;  %vm419_vm15 = vcmp.ge.f32.partialorder %v381_v53, 0.0  ;;  %1532 = vmatprep.subr.mxu0 %v831_v62 }
  0xeb   :  { %1480 = vmatmul.mubr.f32.gmra.mxu1 %v468_v19  ;;  %v452_v60 = vmul.f32 0.01, %v386_v56  ;;  %v482_v61 = vsel %vm418_vm14, %v376_v50, %v450_v55  ;;  %v483_v63 = vsel %vm419_vm15, %v381_v53, %v451_v58  ;;  %vm420_vm0 = vcmp.ge.f32.partialorder %v386_v56, 0.0  ;;  %1533 = vmatpush3.msra.mxu0 %v831_v62 }
  0xec   :  { %1482 = vmatprep.mubr.f32.mxu1 %v469_v22  ;;  %1534 = vmatprep.subr.mxu0 %v830_v3 }
  0xed   :  { %v484_v0 = vsel %vm420_vm0, %v386_v56, %v452_v60  ;;  %1535 = vmatpush3.msra.mxu0 %v830_v3 }
  0xee   :  { %1536 = vmatprep.subr.mxu0 %v829_v4 }
  0xef   :  { %1483 = vmatmul.mubr.f32.gmra.mxu1 %v470_v25  ;;  %1537 = vmatpush3.msra.mxu0 %v829_v4 }
  0xf0   :  { %1485 = vmatprep.mubr.f32.mxu1 %v471_v27 }
  0xf3   :  { %1486 = vmatmul.mubr.f32.gmra.mxu1 %v472_v31 }
  0xf4   :  { %1488 = vmatprep.mubr.f32.mxu1 %v473_v20 }
  0xf7   :  { %1489 = vmatmul.mubr.f32.gmra.mxu1 %v474_v37 }
  0xf8   :  { %1491 = vmatprep.mubr.f32.mxu1 %v475_v38 }
  0xfb   :  { %1492 = vmatmul.mubr.f32.gmra.mxu1 %v476_v44 }
  0xfc   :  { %1494 = vmatprep.mubr.f32.mxu1 %v477_v47 }
  0xff   :  { %1495 = vmatmul.mubr.f32.gmra.mxu1 %v478_v51 }
 0x100   :  { %1497 = vmatprep.mubr.f32.mxu1 %v479_v54 }
 0x103   :  { %1498 = vmatmul.mubr.f32.gmra.mxu1 %v480_v57 }
 0x104   :  { %1500 = vmatprep.mubr.f32.mxu1 %v481_v59 }
 0x107   :  { %1501 = vmatmul.mubr.f32.gmra.mxu1 %v482_v61 }
 0x108   :  { %1503 = vmatprep.mubr.f32.mxu1 %v483_v63 }
 0x10b   :  { %1504 = vmatmul.mubr.f32.gmra.mxu1 %v484_v0 }
 0x18f   :  { %v1460_v7 = vpop.f32.mrf.mxu1 }
 0x190   :  { %v580_v8 = vadd.f32 %v1460_v7, %v1924_v5 }
 0x191   :  { %v574_v9 = vpop.f32.mrf.mxu1 }
 0x192   :  { %v575_v11 = vadd.f32 %v1924_v5, %v574_v9  ;;  %v766_v12 = vmul.f32 0.01, %v580_v8  ;;  %vm734_vm1 = vcmp.ge.f32.partialorder %v580_v8, 0.0 }
 0x193   :  { %v1463_v13 = vpop.f32.mrf.mxu1 }
 0x194   :  { %v765_v6 = vmul.f32 0.01, %v575_v11  ;;  %v590_v14 = vadd.f32 %v1463_v13, %v1924_v5  ;;  %vm733_vm2 = vcmp.ge.f32.partialorder %v575_v11, 0.0  ;;  %v798_v19 = vsel %vm734_vm1, %v580_v8, %v766_v12 }
 0x195   :  { %v584_v15 = vpop.f32.mrf.mxu1 }
 0x196   :  { %v585_v17 = vadd.f32 %v1924_v5, %v584_v15  ;;  %v797_v18 = vsel %vm733_vm2, %v575_v11, %v765_v6  ;;  %v768_v2 = vmul.f32 0.01, %v590_v14  ;;  %vm736_vm4 = vcmp.ge.f32.partialorder %v590_v14, 0.0 }
 0x197   :  { %v1466_v21 = vpop.f32.mrf.mxu1  ;;  %1538 = vmatprep.mubr.f32.mxu0 %v797_v18 }
 0x198   :  { %v767_v22 = vmul.f32 0.01, %v585_v17  ;;  %v600_v16 = vadd.f32 %v1466_v21, %v1924_v5  ;;  %1539 = vmatmul.mubr.f32.vlgmr.msra.gmra.mxu0 %v798_v19  ;;  %vm735_vm3 = vcmp.ge.f32.partialorder %v585_v17, 0.0  ;;  %v800_v27 = vsel %vm736_vm4, %v590_v14, %v768_v2 }
 0x199   :  { %v594_v23 = vpop.f32.mrf.mxu1 }
 0x19a   :  { %v595_v24 = vadd.f32 %v1924_v5, %v594_v23  ;;  %v799_v25 = vsel %vm735_vm3, %v585_v17, %v767_v22  ;;  %v770_v26 = vmul.f32 0.01, %v600_v16  ;;  %vm738_vm6 = vcmp.ge.f32.partialorder %v600_v16, 0.0 }
 0x19b   :  { %v1469_v10 = vpop.f32.mrf.mxu1  ;;  %1541 = vmatprep.mubr.f32.mxu0 %v799_v25 }
 0x19c   :  { %v769_v28 = vmul.f32 0.01, %v595_v24  ;;  %v610_v29 = vadd.f32 %v1469_v10, %v1924_v5  ;;  %1542 = vmatmul.mubr.f32.gmra.mxu0 %v800_v27  ;;  %vm737_vm5 = vcmp.ge.f32.partialorder %v595_v24, 0.0  ;;  %v802_v34 = vsel %vm738_vm6, %v600_v16, %v770_v26 }
 0x19d   :  { %v604_v30 = vpop.f32.mrf.mxu1 }
 0x19e   :  { %v605_v31 = vadd.f32 %v1924_v5, %v604_v30  ;;  %v801_v32 = vsel %vm737_vm5, %v595_v24, %v769_v28  ;;  %v772_v33 = vmul.f32 0.01, %v610_v29  ;;  %vm740_vm8 = vcmp.ge.f32.partialorder %v610_v29, 0.0 }
 0x19f   :  { %v1472_v20 = vpop.f32.mrf.mxu1  ;;  %1544 = vmatprep.mubr.f32.mxu0 %v801_v32 }
 0x1a0   :  { %v771_v35 = vmul.f32 0.01, %v605_v31  ;;  %v620_v36 = vadd.f32 %v1472_v20, %v1924_v5  ;;  %1545 = vmatmul.mubr.f32.gmra.mxu0 %v802_v34  ;;  %vm739_vm7 = vcmp.ge.f32.partialorder %v605_v31, 0.0  ;;  %v804_v42 = vsel %vm740_vm8, %v610_v29, %v772_v33 }
 0x1a1   :  { %v614_v37 = vpop.f32.mrf.mxu1 }
 0x1a2   :  { %v615_v39 = vadd.f32 %v1924_v5, %v614_v37  ;;  %v803_v40 = vsel %vm739_vm7, %v605_v31, %v771_v35  ;;  %v774_v38 = vmul.f32 0.01, %v620_v36  ;;  %vm742_vm10 = vcmp.ge.f32.partialorder %v620_v36, 0.0 }
 0x1a3   :  { %v1475_v41 = vpop.f32.mrf.mxu1  ;;  %1547 = vmatprep.mubr.f32.mxu0 %v803_v40 }
 0x1a4   :  { %v773_v43 = vmul.f32 0.01, %v615_v39  ;;  %v630_v44 = vadd.f32 %v1475_v41, %v1924_v5  ;;  %1548 = vmatmul.mubr.f32.gmra.mxu0 %v804_v42  ;;  %vm741_vm9 = vcmp.ge.f32.partialorder %v615_v39, 0.0  ;;  %v806_v50 = vsel %vm742_vm10, %v620_v36, %v774_v38 }
 0x1a5   :  { %v624_v45 = vpop.f32.mrf.mxu1 }
 0x1a6   :  { %v625_v46 = vadd.f32 %v1924_v5, %v624_v45  ;;  %v805_v47 = vsel %vm741_vm9, %v615_v39, %v773_v43  ;;  %v776_v48 = vmul.f32 0.01, %v630_v44  ;;  %vm744_vm12 = vcmp.ge.f32.partialorder %v630_v44, 0.0 }
 0x1a7   :  { %v1478_v49 = vpop.f32.mrf.mxu1  ;;  %1550 = vmatprep.mubr.f32.mxu0 %v805_v47 }
 0x1a8   :  { %v775_v51 = vmul.f32 0.01, %v625_v46  ;;  %v640_v52 = vadd.f32 %v1478_v49, %v1924_v5  ;;  %1551 = vmatmul.mubr.f32.gmra.mxu0 %v806_v50  ;;  %vm743_vm11 = vcmp.ge.f32.partialorder %v625_v46, 0.0  ;;  %v808_v58 = vsel %vm744_vm12, %v630_v44, %v776_v48 }
 0x1a9   :  { %v634_v53 = vpop.f32.mrf.mxu1 }
 0x1aa   :  { %v635_v54 = vadd.f32 %v1924_v5, %v634_v53  ;;  %v807_v55 = vsel %vm743_vm11, %v625_v46, %v775_v51  ;;  %v778_v56 = vmul.f32 0.01, %v640_v52  ;;  %vm746_vm14 = vcmp.ge.f32.partialorder %v640_v52, 0.0 }
 0x1ab   :  { %v1481_v57 = vpop.f32.mrf.mxu1  ;;  %1553 = vmatprep.mubr.f32.mxu0 %v807_v55 }
 0x1ac   :  { %v777_v59 = vmul.f32 0.01, %v635_v54  ;;  %v650_v60 = vadd.f32 %v1481_v57, %v1924_v5  ;;  %1554 = vmatmul.mubr.f32.gmra.mxu0 %v808_v58  ;;  %vm745_vm13 = vcmp.ge.f32.partialorder %v635_v54, 0.0  ;;  %v810_v3 = vsel %vm746_vm14, %v640_v52, %v778_v56 }
 0x1ad   :  { %v644_v61 = vpop.f32.mrf.mxu1 }
 0x1ae   :  { %v645_v63 = vadd.f32 %v1924_v5, %v644_v61  ;;  %v809_v0 = vsel %vm745_vm13, %v635_v54, %v777_v59  ;;  %v780_v1 = vmul.f32 0.01, %v650_v60  ;;  %vm748_vm0 = vcmp.ge.f32.partialorder %v650_v60, 0.0 }
 0x1af   :  { %v1484_v62 = vpop.f32.mrf.mxu1  ;;  %1556 = vmatprep.mubr.f32.mxu0 %v809_v0 }
 0x1b0   :  { %v779_v4 = vmul.f32 0.01, %v645_v63  ;;  %v660_v7 = vadd.f32 %v1484_v62, %v1924_v5  ;;  %1557 = vmatmul.mubr.f32.gmra.mxu0 %v810_v3  ;;  %vm747_vm15 = vcmp.ge.f32.partialorder %v645_v63, 0.0  ;;  %v812_v6 = vsel %vm748_vm0, %v650_v60, %v780_v1 }
 0x1b1   :  { %v654_v8 = vpop.f32.mrf.mxu1 }
 0x1b2   :  { %v655_v9 = vadd.f32 %v1924_v5, %v654_v8  ;;  %v811_v11 = vsel %vm747_vm15, %v645_v63, %v779_v4  ;;  %v782_v12 = vmul.f32 0.01, %v660_v7  ;;  %vm750_vm2 = vcmp.ge.f32.partialorder %v660_v7, 0.0 }
 0x1b3   :  { %v1487_v13 = vpop.f32.mrf.mxu1  ;;  %1559 = vmatprep.mubr.f32.mxu0 %v811_v11 }
 0x1b4   :  { %v781_v14 = vmul.f32 0.01, %v655_v9  ;;  %v670_v15 = vadd.f32 %v1487_v13, %v1924_v5  ;;  %1560 = vmatmul.mubr.f32.gmra.mxu0 %v812_v6  ;;  %vm749_vm1 = vcmp.ge.f32.partialorder %v655_v9, 0.0  ;;  %v814_v22 = vsel %vm750_vm2, %v660_v7, %v782_v12 }
 0x1b5   :  { %v664_v17 = vpop.f32.mrf.mxu1 }
 0x1b6   :  { %v665_v18 = vadd.f32 %v1924_v5, %v664_v17  ;;  %v813_v19 = vsel %vm749_vm1, %v655_v9, %v781_v14  ;;  %v784_v2 = vmul.f32 0.01, %v670_v15  ;;  %vm752_vm4 = vcmp.ge.f32.partialorder %v670_v15, 0.0  ;;  %v1961_v9 = vld [vmem:[%s2097_s6] ss:$0 sm:$0xff] }
 0x1b7   :  { %v1490_v21 = vpop.f32.mrf.mxu1  ;;  %1562 = vmatprep.mubr.f32.mxu0 %v813_v19 }
 0x1b8   :  { %v783_v16 = vmul.f32 0.01, %v665_v18  ;;  %v680_v23 = vadd.f32 %v1490_v21, %v1924_v5  ;;  %1563 = vmatmul.mubr.f32.gmra.mxu0 %v814_v22  ;;  %vm751_vm3 = vcmp.ge.f32.partialorder %v665_v18, 0.0  ;;  %v816_v28 = vsel %vm752_vm4, %v670_v15, %v784_v2 }
 0x1b9   :  { %v674_v24 = vpop.f32.mrf.mxu1 }
 0x1ba   :  { %v675_v25 = vadd.f32 %v1924_v5, %v674_v24  ;;  %v815_v26 = vsel %vm751_vm3, %v665_v18, %v783_v16  ;;  %v786_v10 = vmul.f32 0.01, %v680_v23  ;;  %vm754_vm6 = vcmp.ge.f32.partialorder %v680_v23, 0.0 }
 0x1bb   :  { %v1493_v27 = vpop.f32.mrf.mxu1  ;;  %1565 = vmatprep.mubr.f32.mxu0 %v815_v26 }
 0x1bc   :  { %v785_v29 = vmul.f32 0.01, %v675_v25  ;;  %v690_v30 = vadd.f32 %v1493_v27, %v1924_v5  ;;  %1566 = vmatmul.mubr.f32.gmra.mxu0 %v816_v28  ;;  %vm753_vm5 = vcmp.ge.f32.partialorder %v675_v25, 0.0  ;;  %v818_v35 = vsel %vm754_vm6, %v680_v23, %v786_v10 }
 0x1bd   :  { %v684_v31 = vpop.f32.mrf.mxu1 }
 0x1be   :  { %v685_v32 = vadd.f32 %v1924_v5, %v684_v31  ;;  %v817_v33 = vsel %vm753_vm5, %v675_v25, %v785_v29  ;;  %v788_v20 = vmul.f32 0.01, %v690_v30  ;;  %vm756_vm8 = vcmp.ge.f32.partialorder %v690_v30, 0.0 }
 0x1bf   :  { %v1496_v34 = vpop.f32.mrf.mxu1  ;;  %1568 = vmatprep.mubr.f32.mxu0 %v817_v33 }
 0x1c0   :  { %v787_v36 = vmul.f32 0.01, %v685_v32  ;;  %v700_v37 = vadd.f32 %v1496_v34, %v1924_v5  ;;  %1569 = vmatmul.mubr.f32.gmra.mxu0 %v818_v35  ;;  %vm755_vm7 = vcmp.ge.f32.partialorder %v685_v32, 0.0  ;;  %v820_v43 = vsel %vm756_vm8, %v690_v30, %v788_v20 }
 0x1c1   :  { %v694_v39 = vpop.f32.mrf.mxu1 }
 0x1c2   :  { %v695_v40 = vadd.f32 %v1924_v5, %v694_v39  ;;  %v819_v38 = vsel %vm755_vm7, %v685_v32, %v787_v36  ;;  %v790_v41 = vmul.f32 0.01, %v700_v37  ;;  %vm758_vm10 = vcmp.ge.f32.partialorder %v700_v37, 0.0 }
 0x1c3   :  { %v1499_v42 = vpop.f32.mrf.mxu1  ;;  %1571 = vmatprep.mubr.f32.mxu0 %v819_v38 }
 0x1c4   :  { %v789_v44 = vmul.f32 0.01, %v695_v40  ;;  %v710_v45 = vadd.f32 %v1499_v42, %v1924_v5  ;;  %1572 = vmatmul.mubr.f32.gmra.mxu0 %v820_v43  ;;  %vm757_vm9 = vcmp.ge.f32.partialorder %v695_v40, 0.0  ;;  %v822_v51 = vsel %vm758_vm10, %v700_v37, %v790_v41 }
 0x1c5   :  { %v704_v46 = vpop.f32.mrf.mxu1 }
 0x1c6   :  { %v705_v47 = vadd.f32 %v1924_v5, %v704_v46  ;;  %v821_v48 = vsel %vm757_vm9, %v695_v40, %v789_v44  ;;  %v792_v49 = vmul.f32 0.01, %v710_v45  ;;  %vm760_vm12 = vcmp.ge.f32.partialorder %v710_v45, 0.0 }
 0x1c7   :  { %v1502_v50 = vpop.f32.mrf.mxu1  ;;  %1574 = vmatprep.mubr.f32.mxu0 %v821_v48 }
 0x1c8   :  { %v791_v52 = vmul.f32 0.01, %v705_v47  ;;  %v720_v53 = vadd.f32 %v1502_v50, %v1924_v5  ;;  %1575 = vmatmul.mubr.f32.gmra.mxu0 %v822_v51  ;;  %vm759_vm11 = vcmp.ge.f32.partialorder %v705_v47, 0.0  ;;  %v824_v59 = vsel %vm760_vm12, %v710_v45, %v792_v49 }
 0x1c9   :  { %v714_v54 = vpop.f32.mrf.mxu1 }
 0x1ca   :  { %v715_v55 = vadd.f32 %v1924_v5, %v714_v54  ;;  %v823_v56 = vsel %vm759_vm11, %v705_v47, %v791_v52  ;;  %v794_v57 = vmul.f32 0.01, %v720_v53  ;;  %vm762_vm14 = vcmp.ge.f32.partialorder %v720_v53, 0.0 }
 0x1cb   :  { %v1505_v58 = vpop.f32.mrf.mxu1  ;;  %1577 = vmatprep.mubr.f32.mxu0 %v823_v56 }
 0x1cc   :  { %v793_v60 = vmul.f32 0.01, %v715_v55  ;;  %v730_v61 = vadd.f32 %v1505_v58, %v1924_v5  ;;  %1578 = vmatmul.mubr.f32.gmra.mxu0 %v824_v59  ;;  %vm761_vm13 = vcmp.ge.f32.partialorder %v715_v55, 0.0  ;;  %v826_v3 = vsel %vm762_vm14, %v720_v53, %v794_v57 }
 0x1cd   :  { %v724_v63 = vpop.f32.mrf.mxu1 }
 0x1ce   :  { %v725_v0 = vadd.f32 %v1924_v5, %v724_v63  ;;  %v825_v1 = vsel %vm761_vm13, %v715_v55, %v793_v60  ;;  %v796_v62 = vmul.f32 0.01, %v730_v61  ;;  %vm764_vm0 = vcmp.ge.f32.partialorder %v730_v61, 0.0 }
 0x1cf   :  { %1580 = vmatprep.mubr.f32.mxu0 %v825_v1 }
 0x1d0   :  { %v795_v4 = vmul.f32 0.01, %v725_v0  ;;  %1581 = vmatmul.mubr.f32.gmra.mxu0 %v826_v3  ;;  %vm763_vm15 = vcmp.ge.f32.partialorder %v725_v0, 0.0  ;;  %v828_v8 = vsel %vm764_vm0, %v730_v61, %v796_v62 }
 0x1d2   :  { %v827_v7 = vsel %vm763_vm15, %v725_v0, %v795_v4 }
 0x1d3   :  { %1583 = vmatprep.mubr.f32.mxu0 %v827_v7 }
 0x1d4   :  { %1584 = vmatmul.mubr.f32.gmra.mxu0 %v828_v8 }
 0x258   :  { %v1540_v11 = vpop.f32.mrf.mxu0 }
 0x259   :  { %v924_v5 = vadd.f32 %v1540_v11, %v1961_v9 }
 0x25a   :  { %v918_v12 = vpop.f32.mrf.mxu0 }
 0x25b   :  { %vm1078_vm1 = vcmp.ge.f32.partialorder %v924_v5, 0.0  ;;  %v1110_v13 = vmul.f32 0.01, %v924_v5  ;;  %v919_v6 = vadd.f32 %v1961_v9, %v918_v12 }
 0x25c   :  { %v1543_v14 = vpop.f32.mrf.mxu0 }
 0x25d   :  { %v1142_v15 = vsel %vm1078_vm1, %v924_v5, %v1110_v13  ;;  %vm1077_vm2 = vcmp.ge.f32.partialorder %v919_v6, 0.0  ;;  %v1109_v17 = vmul.f32 0.01, %v919_v6  ;;  %v934_v18 = vadd.f32 %v1543_v14, %v1961_v9 }
 0x25e   :  { %1174 = vst [vmem:[%s2098_s7 + $0x8] sm:$0xff] %v1142_v15  ;;  %v928_v19 = vpop.f32.mrf.mxu0 }
 0x25f   :  { %v1141_v2 = vsel %vm1077_vm2, %v919_v6, %v1109_v17  ;;  %vm1080_vm3 = vcmp.ge.f32.partialorder %v934_v18, 0.0  ;;  %v1112_v21 = vmul.f32 0.01, %v934_v18  ;;  %v929_v22 = vadd.f32 %v1961_v9, %v928_v19 }
 0x260   :  { %1173 = vst [vmem:[%s2098_s7] sm:$0xff] %v1141_v2  ;;  %v1546_v16 = vpop.f32.mrf.mxu0 }
 0x261   :  { %v1144_v23 = vsel %vm1080_vm3, %v934_v18, %v1112_v21  ;;  %vm1079_vm4 = vcmp.ge.f32.partialorder %v929_v22, 0.0  ;;  %v1111_v24 = vmul.f32 0.01, %v929_v22  ;;  %v944_v25 = vadd.f32 %v1546_v16, %v1961_v9 }
 0x262   :  { %1176 = vst [vmem:[%s2098_s7 + $0x18] sm:$0xff] %v1144_v23  ;;  %v938_v26 = vpop.f32.mrf.mxu0 }
 0x263   :  { %v1143_v10 = vsel %vm1079_vm4, %v929_v22, %v1111_v24  ;;  %vm1082_vm5 = vcmp.ge.f32.partialorder %v944_v25, 0.0  ;;  %v1114_v27 = vmul.f32 0.01, %v944_v25  ;;  %v939_v28 = vadd.f32 %v1961_v9, %v938_v26 }
 0x264   :  { %1175 = vst [vmem:[%s2098_s7 + $0x10] sm:$0xff] %v1143_v10  ;;  %v1549_v29 = vpop.f32.mrf.mxu0 }
 0x265   :  { %v1146_v30 = vsel %vm1082_vm5, %v944_v25, %v1114_v27  ;;  %vm1081_vm6 = vcmp.ge.f32.partialorder %v939_v28, 0.0  ;;  %v1113_v31 = vmul.f32 0.01, %v939_v28  ;;  %v954_v32 = vadd.f32 %v1549_v29, %v1961_v9 }
 0x266   :  { %1178 = vst [vmem:[%s2098_s7 + $0x28] sm:$0xff] %v1146_v30  ;;  %v948_v33 = vpop.f32.mrf.mxu0 }
 0x267   :  { %v1145_v20 = vsel %vm1081_vm6, %v939_v28, %v1113_v31  ;;  %vm1084_vm7 = vcmp.ge.f32.partialorder %v954_v32, 0.0  ;;  %v1116_v34 = vmul.f32 0.01, %v954_v32  ;;  %v949_v35 = vadd.f32 %v1961_v9, %v948_v33 }
 0x268   :  { %1177 = vst [vmem:[%s2098_s7 + $0x20] sm:$0xff] %v1145_v20  ;;  %v1552_v36 = vpop.f32.mrf.mxu0 }
 0x269   :  { %v1148_v37 = vsel %vm1084_vm7, %v954_v32, %v1116_v34  ;;  %vm1083_vm8 = vcmp.ge.f32.partialorder %v949_v35, 0.0  ;;  %v1115_v39 = vmul.f32 0.01, %v949_v35  ;;  %v964_v40 = vadd.f32 %v1552_v36, %v1961_v9 }
 0x26a   :  { %1180 = vst [vmem:[%s2098_s7 + $0x38] sm:$0xff] %v1148_v37  ;;  %v958_v38 = vpop.f32.mrf.mxu0 }
 0x26b   :  { %v1147_v41 = vsel %vm1083_vm8, %v949_v35, %v1115_v39  ;;  %vm1086_vm9 = vcmp.ge.f32.partialorder %v964_v40, 0.0  ;;  %v1118_v42 = vmul.f32 0.01, %v964_v40  ;;  %v959_v43 = vadd.f32 %v1961_v9, %v958_v38 }
 0x26c   :  { %1179 = vst [vmem:[%s2098_s7 + $0x30] sm:$0xff] %v1147_v41  ;;  %v1555_v44 = vpop.f32.mrf.mxu0 }
 0x26d   :  { %v1150_v45 = vsel %vm1086_vm9, %v964_v40, %v1118_v42  ;;  %vm1085_vm10 = vcmp.ge.f32.partialorder %v959_v43, 0.0  ;;  %v1117_v46 = vmul.f32 0.01, %v959_v43  ;;  %v974_v47 = vadd.f32 %v1555_v44, %v1961_v9 }
 0x26e   :  { %1182 = vst [vmem:[%s2098_s7 + $0x48] sm:$0xff] %v1150_v45  ;;  %v968_v48 = vpop.f32.mrf.mxu0 }
 0x26f   :  { %v1149_v49 = vsel %vm1085_vm10, %v959_v43, %v1117_v46  ;;  %vm1088_vm11 = vcmp.ge.f32.partialorder %v974_v47, 0.0  ;;  %v1120_v50 = vmul.f32 0.01, %v974_v47  ;;  %v969_v51 = vadd.f32 %v1961_v9, %v968_v48 }
 0x270   :  { %1181 = vst [vmem:[%s2098_s7 + $0x40] sm:$0xff] %v1149_v49  ;;  %v1558_v52 = vpop.f32.mrf.mxu0 }
 0x271   :  { %v1152_v53 = vsel %vm1088_vm11, %v974_v47, %v1120_v50  ;;  %vm1087_vm12 = vcmp.ge.f32.partialorder %v969_v51, 0.0  ;;  %v1119_v54 = vmul.f32 0.01, %v969_v51  ;;  %v984_v55 = vadd.f32 %v1558_v52, %v1961_v9 }
 0x272   :  { %1184 = vst [vmem:[%s2098_s7 + $0x58] sm:$0xff] %v1152_v53  ;;  %v978_v56 = vpop.f32.mrf.mxu0 }
 0x273   :  { %v1151_v57 = vsel %vm1087_vm12, %v969_v51, %v1119_v54  ;;  %vm1090_vm13 = vcmp.ge.f32.partialorder %v984_v55, 0.0  ;;  %v1122_v58 = vmul.f32 0.01, %v984_v55  ;;  %v979_v59 = vadd.f32 %v1961_v9, %v978_v56 }
 0x274   :  { %1183 = vst [vmem:[%s2098_s7 + $0x50] sm:$0xff] %v1151_v57  ;;  %v1561_v60 = vpop.f32.mrf.mxu0 }
 0x275   :  { %v1154_v61 = vsel %vm1090_vm13, %v984_v55, %v1122_v58  ;;  %vm1089_vm14 = vcmp.ge.f32.partialorder %v979_v59, 0.0  ;;  %v1121_v63 = vmul.f32 0.01, %v979_v59  ;;  %v994_v0 = vadd.f32 %v1561_v60, %v1961_v9 }
 0x276   :  { %1186 = vst [vmem:[%s2098_s7 + $0x68] sm:$0xff] %v1154_v61  ;;  %v988_v1 = vpop.f32.mrf.mxu0 }
 0x277   :  { %v1153_v62 = vsel %vm1089_vm14, %v979_v59, %v1121_v63  ;;  %vm1092_vm15 = vcmp.ge.f32.partialorder %v994_v0, 0.0  ;;  %v1124_v3 = vmul.f32 0.01, %v994_v0  ;;  %v989_v4 = vadd.f32 %v1961_v9, %v988_v1 }
 0x278   :  { %1185 = vst [vmem:[%s2098_s7 + $0x60] sm:$0xff] %v1153_v62  ;;  %v1564_v7 = vpop.f32.mrf.mxu0 }
 0x279   :  { %v1156_v8 = vsel %vm1092_vm15, %v994_v0, %v1124_v3  ;;  %vm1091_vm0 = vcmp.ge.f32.partialorder %v989_v4, 0.0  ;;  %v1123_v11 = vmul.f32 0.01, %v989_v4  ;;  %v1004_v5 = vadd.f32 %v1564_v7, %v1961_v9 }
 0x27a   :  { %1188 = vst [vmem:[%s2098_s7 + $0x78] sm:$0xff] %v1156_v8  ;;  %v998_v12 = vpop.f32.mrf.mxu0 }
 0x27b   :  { %v1155_v13 = vsel %vm1091_vm0, %v989_v4, %v1123_v11  ;;  %vm1094_vm1 = vcmp.ge.f32.partialorder %v1004_v5, 0.0  ;;  %v1126_v6 = vmul.f32 0.01, %v1004_v5  ;;  %v999_v14 = vadd.f32 %v1961_v9, %v998_v12 }
 0x27c   :  { %1187 = vst [vmem:[%s2098_s7 + $0x70] sm:$0xff] %v1155_v13  ;;  %v1567_v15 = vpop.f32.mrf.mxu0 }
 0x27d   :  { %v1158_v17 = vsel %vm1094_vm1, %v1004_v5, %v1126_v6  ;;  %vm1093_vm2 = vcmp.ge.f32.partialorder %v999_v14, 0.0  ;;  %v1125_v18 = vmul.f32 0.01, %v999_v14  ;;  %v1014_v19 = vadd.f32 %v1567_v15, %v1961_v9 }
 0x27e   :  { %1190 = vst [vmem:[%s2098_s7 + $0x88] sm:$0xff] %v1158_v17  ;;  %v1008_v2 = vpop.f32.mrf.mxu0 }
 0x27f   :  { %v1157_v21 = vsel %vm1093_vm2, %v999_v14, %v1125_v18  ;;  %vm1096_vm3 = vcmp.ge.f32.partialorder %v1014_v19, 0.0  ;;  %v1128_v22 = vmul.f32 0.01, %v1014_v19  ;;  %v1009_v16 = vadd.f32 %v1961_v9, %v1008_v2 }
 0x280   :  { %1189 = vst [vmem:[%s2098_s7 + $0x80] sm:$0xff] %v1157_v21  ;;  %v1570_v23 = vpop.f32.mrf.mxu0 }
 0x281   :  { %v1160_v24 = vsel %vm1096_vm3, %v1014_v19, %v1128_v22  ;;  %vm1095_vm4 = vcmp.ge.f32.partialorder %v1009_v16, 0.0  ;;  %v1127_v25 = vmul.f32 0.01, %v1009_v16  ;;  %v1024_v26 = vadd.f32 %v1570_v23, %v1961_v9 }
 0x282   :  { %1192 = vst [vmem:[%s2098_s7 + $0x98] sm:$0xff] %v1160_v24  ;;  %v1018_v10 = vpop.f32.mrf.mxu0 }
 0x283   :  { %v1159_v27 = vsel %vm1095_vm4, %v1009_v16, %v1127_v25  ;;  %vm1098_vm5 = vcmp.ge.f32.partialorder %v1024_v26, 0.0  ;;  %v1130_v28 = vmul.f32 0.01, %v1024_v26  ;;  %v1019_v29 = vadd.f32 %v1961_v9, %v1018_v10 }
 0x284   :  { %1191 = vst [vmem:[%s2098_s7 + $0x90] sm:$0xff] %v1159_v27  ;;  %v1573_v30 = vpop.f32.mrf.mxu0 }
 0x285   :  { %v1162_v31 = vsel %vm1098_vm5, %v1024_v26, %v1130_v28  ;;  %vm1097_vm6 = vcmp.ge.f32.partialorder %v1019_v29, 0.0  ;;  %v1129_v32 = vmul.f32 0.01, %v1019_v29  ;;  %v1034_v33 = vadd.f32 %v1573_v30, %v1961_v9 }
 0x286   :  { %1194 = vst [vmem:[%s2098_s7 + $0xa8] sm:$0xff] %v1162_v31  ;;  %v1028_v20 = vpop.f32.mrf.mxu0 }
 0x287   :  { %v1161_v34 = vsel %vm1097_vm6, %v1019_v29, %v1129_v32  ;;  %vm1100_vm7 = vcmp.ge.f32.partialorder %v1034_v33, 0.0  ;;  %v1132_v35 = vmul.f32 0.01, %v1034_v33  ;;  %v1029_v36 = vadd.f32 %v1961_v9, %v1028_v20 }
 0x288   :  { %1193 = vst [vmem:[%s2098_s7 + $0xa0] sm:$0xff] %v1161_v34  ;;  %v1576_v37 = vpop.f32.mrf.mxu0 }
 0x289   :  { %v1164_v39 = vsel %vm1100_vm7, %v1034_v33, %v1132_v35  ;;  %vm1099_vm8 = vcmp.ge.f32.partialorder %v1029_v36, 0.0  ;;  %v1131_v40 = vmul.f32 0.01, %v1029_v36  ;;  %v1044_v38 = vadd.f32 %v1576_v37, %v1961_v9 }
 0x28a   :  { %1196 = vst [vmem:[%s2098_s7 + $0xb8] sm:$0xff] %v1164_v39  ;;  %v1038_v41 = vpop.f32.mrf.mxu0 }
 0x28b   :  { %v1163_v42 = vsel %vm1099_vm8, %v1029_v36, %v1131_v40  ;;  %vm1102_vm9 = vcmp.ge.f32.partialorder %v1044_v38, 0.0  ;;  %v1134_v43 = vmul.f32 0.01, %v1044_v38  ;;  %v1039_v44 = vadd.f32 %v1961_v9, %v1038_v41 }
 0x28c   :  { %1195 = vst [vmem:[%s2098_s7 + $0xb0] sm:$0xff] %v1163_v42  ;;  %v1579_v45 = vpop.f32.mrf.mxu0 }
 0x28d   :  { %v1166_v46 = vsel %vm1102_vm9, %v1044_v38, %v1134_v43  ;;  %vm1101_vm10 = vcmp.ge.f32.partialorder %v1039_v44, 0.0  ;;  %v1133_v47 = vmul.f32 0.01, %v1039_v44  ;;  %v1054_v48 = vadd.f32 %v1579_v45, %v1961_v9 }
 0x28e   :  { %1198 = vst [vmem:[%s2098_s7 + $0xc8] sm:$0xff] %v1166_v46  ;;  %v1048_v49 = vpop.f32.mrf.mxu0 }
 0x28f   :  { %v1165_v50 = vsel %vm1101_vm10, %v1039_v44, %v1133_v47  ;;  %vm1104_vm11 = vcmp.ge.f32.partialorder %v1054_v48, 0.0  ;;  %v1136_v51 = vmul.f32 0.01, %v1054_v48  ;;  %v1049_v52 = vadd.f32 %v1961_v9, %v1048_v49 }
 0x290   :  { %1197 = vst [vmem:[%s2098_s7 + $0xc0] sm:$0xff] %v1165_v50  ;;  %v1582_v53 = vpop.f32.mrf.mxu0 }
 0x291   :  { %v1168_v54 = vsel %vm1104_vm11, %v1054_v48, %v1136_v51  ;;  %vm1103_vm12 = vcmp.ge.f32.partialorder %v1049_v52, 0.0  ;;  %v1135_v55 = vmul.f32 0.01, %v1049_v52  ;;  %v1064_v56 = vadd.f32 %v1582_v53, %v1961_v9 }
 0x292   :  { %1200 = vst [vmem:[%s2098_s7 + $0xd8] sm:$0xff] %v1168_v54  ;;  %v1058_v57 = vpop.f32.mrf.mxu0 }
 0x293   :  { %v1167_v58 = vsel %vm1103_vm12, %v1049_v52, %v1135_v55  ;;  %vm1106_vm13 = vcmp.ge.f32.partialorder %v1064_v56, 0.0  ;;  %v1138_v59 = vmul.f32 0.01, %v1064_v56  ;;  %v1059_v60 = vadd.f32 %v1961_v9, %v1058_v57 }
 0x294   :  { %1199 = vst [vmem:[%s2098_s7 + $0xd0] sm:$0xff] %v1167_v58  ;;  %v1585_v61 = vpop.f32.mrf.mxu0 }
 0x295   :  { %v1170_v63 = vsel %vm1106_vm13, %v1064_v56, %v1138_v59  ;;  %vm1105_vm14 = vcmp.ge.f32.partialorder %v1059_v60, 0.0  ;;  %v1137_v0 = vmul.f32 0.01, %v1059_v60  ;;  %v1074_v1 = vadd.f32 %v1585_v61, %v1961_v9 }
 0x296   :  { %1202 = vst [vmem:[%s2098_s7 + $0xe8] sm:$0xff] %v1170_v63  ;;  %v1068_v62 = vpop.f32.mrf.mxu0 }
 0x297   :  { %v1169_v3 = vsel %vm1105_vm14, %v1059_v60, %v1137_v0  ;;  %vm1108_vm15 = vcmp.ge.f32.partialorder %v1074_v1, 0.0  ;;  %v1140_v4 = vmul.f32 0.01, %v1074_v1  ;;  %v1069_v7 = vadd.f32 %v1961_v9, %v1068_v62 }
 0x298   :  { %1201 = vst [vmem:[%s2098_s7 + $0xe0] sm:$0xff] %v1169_v3 }
 0x299   :  { %v1172_v8 = vsel %vm1108_vm15, %v1074_v1, %v1140_v4  ;;  %vm1107_vm0 = vcmp.ge.f32.partialorder %v1069_v7, 0.0  ;;  %v1139_v11 = vmul.f32 0.01, %v1069_v7 }
 0x29a   :  { %1204 = vst [vmem:[%s2098_s7 + $0xf8] sm:$0xff] %v1172_v8 }
 0x29b   :  { %v1171_v5 = vsel %vm1107_vm0, %v1069_v7, %v1139_v11 }
 0x29c   :  { %1203 = vst [vmem:[%s2098_s7 + $0xf0] sm:$0xff] %v1171_v5 }

</bundles_post_ra>
